<compile_context>
chip_gen: v7x
topology: tpu7x:2x2x1
jax: 0.10.0
libtpu: 0.0.40
codegen_flags: <defaults>
</compile_context>

<pallas_src>
import math
import numpy as np
import jax
import jax.numpy as jnp
from jax.experimental import pallas as pl
from jax.experimental.pallas import tpu as pltpu


def _round_up(x, m):
    return (x + m - 1) // m * m


def _vmem_budget_bytes():
    """Per-generation VMEM budget (~3/4 of physical VMEM)."""
    cap = 64 << 20
    try:
        info = pltpu.get_tpu_info()
        cap = int(getattr(info, "vmem_capacity_bytes", cap) or cap)
    except Exception:
        pass
    return cap * 3 // 4


# --------------------------------------------------------------------------
# kernel 1: fw[r, node-tile, out-tile] = features[node-tile] @ W[r, :, out-tile]
# --------------------------------------------------------------------------
def _fw_kernel(feat_ref, w_ref, fw_ref):
    fw_ref[0] = jnp.dot(
        feat_ref[...], w_ref[0], preferred_element_type=jnp.float32
    ).astype(fw_ref.dtype)


# --------------------------------------------------------------------------
# wrapper
# --------------------------------------------------------------------------
def rgc_forward_pallas(features, weights, adj3, bias, *, triples=None,
                       tm=512, tk=1024):
    """R-GCN forward (horizontal stacking, no decomposition, bias).

    features (N, in_dim); weights (R, in_dim, out_dim); adj3 (R, N, N) with
    adj3[r] == adj[:, r*N:(r+1)*N]; bias (out_dim,); triples (E, 3) int
    [subject, relation, object] used only to build the block-sparse tile
    schedule (falls back to a dense host scan of adj3 if omitted).
    Returns (N, out_dim) float32.

    Note: the tile schedule is built on the host (concrete values needed for
    the grid extent), so this wrapper is not meant to be jitted as a whole.
    """
    N, in_dim = features.shape
    R, _, out_dim = weights.shape

    OUT = _round_up(out_dim, 128)              # lane-dense output tiles
    IN_P = _round_up(in_dim, 128)              # lane-dense contraction in k1

    TM = min(tm, _round_up(N, 8))              # output row tile (sublane mult.)
    NI = _round_up(N, TM)
    # v7x: keep >= 2 row-tiles on the only 'parallel' axis when N allows
    if NI // TM < 2 and N > 256:
        TM = _round_up((N + 1) // 2, 8)
        NI = _round_up(N, TM)
    TK = min(tk, _round_up(N, 128))            # adj contraction tile (lane mult.)
    NK = _round_up(N, TK)
    n_i, n_k = NI // TM, NK // TK

    budget = _vmem_budget_bytes()

    # --- bf16 padded inputs (halved DMA bytes, native MXU rate); pads = 0 ---
    feat_p = jnp.zeros((NK, IN_P), jnp.bfloat16).at[:N, :in_dim].set(
        features.astype(jnp.bfloat16))
    w_p = jnp.zeros((R, IN_P, OUT), jnp.bfloat16).at[:, :in_dim, :out_dim].set(
        weights.astype(jnp.bfloat16))
    adj_p = jnp.zeros((R, NI, NK), jnp.bfloat16).at[:, :N, :N].set(
        adj3.astype(jnp.bfloat16))
    bias_p = jnp.zeros((1, OUT), jnp.float32).at[0, :out_dim].set(
        bias.astype(jnp.float32))

    # --- kernel 1: fw = einsum('ni,rio->rno', feat, W), computed once ---
    TK1 = TK if TK <= 512 else TK // 2         # node tile for kernel 1
    n_k1 = NK // TK1
    if OUT % 512 == 0:
        TO = 512
    elif OUT % 256 == 0:
        TO = 256
    else:
        TO = 128
    n_o = OUT // TO
    # TODO(synk): for extremely large in_dim also tile IN_P in kernel 1.

    ce1 = pl.CostEstimate(
        flops=2 * R * NK * IN_P * OUT,
        transcendentals=0,
        bytes_accessed=int(NK * IN_P * 2 + n_k1 * R * IN_P * OUT * 2
                           + R * NK * OUT * 2))

    fw = pl.pallas_call(
        _fw_kernel,
        out_shape=jax.ShapeDtypeStruct((R, NK, OUT), jnp.bfloat16),
        grid_spec=pltpu.PrefetchScalarGridSpec(
            num_scalar_prefetch=0,
            grid=(n_k1, R, n_o),
            in_specs=[
                pl.BlockSpec((TK1, IN_P), lambda k, r, o: (k, 0)),
                pl.BlockSpec((1, IN_P, TO), lambda k, r, o: (r, 0, o)),
            ],
            out_specs=pl.BlockSpec((1, TK1, TO), lambda k, r, o: (r, k, o)),
        ),
        compiler_params=pltpu.CompilerParams(
            dimension_semantics=("parallel", "arbitrary", "arbitrary"),
            vmem_limit_bytes=int(budget)),
        cost_estimate=ce1,
    )(feat_p, w_p)

    # --- block-sparse tile schedule, built O(E) from the sparse triples ---
    if triples is not None:
        t = np.asarray(jax.device_get(triples))
        r_t = t[:, 1].astype(np.int64)
        i_t = t[:, 0].astype(np.int64) // TM
        k_t = t[:, 2].astype(np.int64) // TK
        flags = np.zeros((R * n_i * n_k,), dtype=bool)
        flags[(r_t * n_i + i_t) * n_k + k_t] = True
    else:
        a = np.zeros((R, NI, NK), np.float32)
        a[:, :N, :N] = np.asarray(jax.device_get(adj3))
        flags = np.any(a.reshape(R, n_i, TM, n_k, TK) != 0,
                       axis=(2, 4)).reshape(-1)

    # per output row-tile: compacted list of nonzero (r, k) adjacency blocks
    fl = flags.reshape(R, n_i, n_k).transpose(1, 0, 2).reshape(n_i, R * n_k)
    counts_np = fl.sum(axis=1).astype(np.int32)              # (n_i,)
    n_sched = max(int(counts_np.max()), 1)
    sched_r_np = np.zeros((n_i, n_sched), np.int32)
    sched_k_np = np.zeros((n_i, n_sched), np.int32)
    for i in range(n_i):
        idx = np.nonzero(fl[i])[0]
        if idx.size:
            rs = (idx // n_k).astype(np.int32)
            ks = (idx % n_k).astype(np.int32)
            sched_r_np[i, :idx.size] = rs
            sched_k_np[i, :idx.size] = ks
            # pad with the last real entry: identical block index -> no new DMA
            sched_r_np[i, idx.size:] = rs[-1]
            sched_k_np[i, idx.size:] = ks[-1]
    sched_r = jnp.asarray(sched_r_np.reshape(-1))             # SMEM, 1D
    sched_k = jnp.asarray(sched_k_np.reshape(-1))
    counts = jnp.asarray(counts_np)
    nnz_tiles = int(counts_np.sum())

    # --- kernel 2: out[i] = bias + sum over scheduled (r,k): adj tile @ fw ---
    fw_bytes = R * NK * OUT * 2
    resident_need = (2 * fw_bytes + 2 * TM * TK * 2 + 2 * TM * OUT * 4
                     + 2 * OUT * 4 + (4 << 20))
    use_resident_fw = resident_need <= budget

    if use_resident_fw:
        # fw pinned resident in VMEM: DMA'd once, no per-row-tile re-read.
        fw_in = fw.reshape(R * NK, OUT)

        def adj_kernel(sr_ref, sk_ref, cnt_ref, adj_ref, fw_ref, bias_ref,
                       out_ref):
            i = pl.program_id(0)
            s = pl.program_id(1)

            @pl.when(s == 0)
            def _():
                out_ref[...] = jnp.broadcast_to(bias_ref[...], out_ref.shape)

            @pl.when(s < cnt_ref[i])
            def _():
                r = sr_ref[i * n_sched + s]
                k = sk_ref[i * n_sched + s]
                off = pl.multiple_of(r * NK + k * TK, TK)
                out_ref[...] += jnp.dot(adj_ref[0],
                                        fw_ref[pl.ds(off, TK), :],
                                        preferred_element_type=jnp.float32)

        fw_spec = pl.BlockSpec((R * NK, OUT), lambda i, s, sr, sk, cnt: (0, 0))
        fw_traffic = fw_bytes
    else:
        # fallback: per-block fw DMA, still only for scheduled nonzero tiles.
        fw_in = fw

        def adj_kernel(sr_ref, sk_ref, cnt_ref, adj_ref, fw_ref, bias_ref,
                       out_ref):
            i = pl.program_id(0)
            s = pl.program_id(1)

            @pl.when(s == 0)
            def _():
                out_ref[...] = jnp.broadcast_to(bias_ref[...], out_ref.shape)

            @pl.when(s < cnt_ref[i])
            def _():
                out_ref[...] += jnp.dot(adj_ref[0], fw_ref[0],
                                        preferred_element_type=jnp.float32)

        fw_spec = pl.BlockSpec(
            (1, TK, OUT),
            lambda i, s, sr, sk, cnt: (sr[i * n_sched + s],
                                       sk[i * n_sched + s], 0))
        fw_traffic = nnz_tiles * TK * OUT * 2

    adj_spec = pl.BlockSpec(
        (1, TM, TK),
        lambda i, s, sr, sk, cnt: (sr[i * n_sched + s], i,
                                   sk[i * n_sched + s]))

    ce2 = pl.CostEstimate(
        flops=2 * nnz_tiles * TM * TK * OUT,
        transcendentals=0,
        bytes_accessed=int(nnz_tiles * TM * TK * 2 + fw_traffic
                           + NI * OUT * 4 + OUT * 4))

    out_full = pl.pallas_call(
        adj_kernel,
        out_shape=jax.ShapeDtypeStruct((NI, OUT), jnp.float32),
        grid_spec=pltpu.PrefetchScalarGridSpec(
            num_scalar_prefetch=3,                  # sched_r, sched_k, counts
            grid=(n_i, n_sched),
            in_specs=[
                adj_spec,
                fw_spec,
                pl.BlockSpec((1, OUT), lambda i, s, sr, sk, cnt: (0, 0)),
            ],
            out_specs=pl.BlockSpec((TM, OUT), lambda i, s, sr, sk, cnt: (i, 0)),
        ),
        compiler_params=pltpu.CompilerParams(
            dimension_semantics=("parallel", "arbitrary"),
            vmem_limit_bytes=int(budget)),
        cost_estimate=ce2,
    )(sched_r, sched_k, counts, adj_p, fw_in, bias_p)

    return out_full[:N, :out_dim]


# --------------------------------------------------------------------------
# JAX glue replicating stack_matrices + sum_sparse + normalization
# (horizontal stacking / vertical_stacking=False path), densified.
# TODO(synk): keep adj truly sparse (COO segment ops) at realistic N; the
# dense (R, N, N) slab here is only for the self-contained demo.
# --------------------------------------------------------------------------
def build_normalized_adj(triples, num_nodes, num_relations):
    s = triples[:, 0]
    p = triples[:, 1]
    o = triples[:, 2]
    rows = s
    cols = p * num_nodes + o                        # horizontal stacking
    num_triples = triples.shape[0]
    vals = jnp.ones((num_triples,), jnp.float32)

    # sum_sparse(..., row_normalisation=False): per-edge column sums
    col_sums = jax.ops.segment_sum(vals, cols,
                                   num_segments=num_relations * num_nodes)
    sums = col_sums[cols]
    # swap fwd/inv sums — assumes triple order [fwd(n), inv(n), self-loops(N)]
    n = (num_triples - num_nodes) // 2
    sums = jnp.concatenate([sums[n:2 * n], sums[:n], sums[2 * n:]], axis=0)
    vals = vals / sums

    adj = jnp.zeros((num_nodes, num_relations * num_nodes), jnp.float32)
    adj = adj.at[rows, cols].add(vals)              # duplicates sum, like sparse
    adj3 = adj.reshape(num_nodes, num_relations, num_nodes).transpose(1, 0, 2)
    return adj3


def reference_forward_f32(features, weights, adj3, bias):
    fw = jnp.einsum('ni,rio->rno', features, weights,
                    precision=jax.lax.Precision.HIGHEST)
    return jnp.einsum('rnm,rmo->no', adj3, fw,
                      precision=jax.lax.Precision.HIGHEST) + bias


def reference_forward_bf16(features, weights, adj3, bias):
    f = features.astype(jnp.bfloat16).astype(jnp.float32)
    w = weights.astype(jnp.bfloat16).astype(jnp.float32)
    a = adj3.astype(jnp.bfloat16).astype(jnp.float32)
    fw = jnp.einsum('ni,rio->rno', f, w,
                    precision=jax.lax.Precision.HIGHEST)
    fw = fw.astype(jnp.bfloat16).astype(jnp.float32)
    return jnp.einsum('rnm,rmo->no', a, fw,
                      precision=jax.lax.Precision.HIGHEST) + bias


if __name__ == "__main__":
    # ----- module configuration (small, consistent with the forward) -----
    num_nodes = 8
    in_features = 16
    out_features = 32
    num_base_rels = 2
    num_relations = 2 * num_base_rels + 1           # fwd + inverse + self-loop

    key = jax.random.PRNGKey(0)
    k_s, k_p, k_o, k_w, k_f = jax.random.split(key, 5)

    # deterministic synthetic graph: fwd edges, inverse edges, self-loops
    n_edges = 10
    subj = jax.random.randint(k_s, (n_edges,), 0, num_nodes)
    rel = jax.random.randint(k_p, (n_edges,), 0, num_base_rels)
    obj = jax.random.randint(k_o, (n_edges,), 0, num_nodes)
    fwd = jnp.stack([subj, rel, obj], axis=1)
    inv = jnp.stack([obj, rel + num_base_rels, subj], axis=1)
    node_ids = jnp.arange(num_nodes)
    self_loops = jnp.stack(
        [node_ids, jnp.full((num_nodes,), 2 * num_base_rels), node_ids], axis=1)
    triples = jnp.concatenate([fwd, inv, self_loops], axis=0).astype(jnp.int32)

    # implicit contract of the sums swap (and of the PyTorch layer):
    # triples ordered [fwd(n), inverse(n), self-loops(num_nodes)]
    assert bool(jnp.all(triples[-num_nodes:, 1] == num_relations - 1))

    # parameters: xavier_uniform(gain=relu) weights, zero bias
    gain = math.sqrt(2.0)
    fan_in = in_features * out_features             # PyTorch fan rules, 3D param
    fan_out = num_relations * out_features
    bound = gain * math.sqrt(6.0 / (fan_in + fan_out))
    weights = jax.random.uniform(
        k_w, (num_relations, in_features, out_features),
        minval=-bound, maxval=bound, dtype=jnp.float32)
    bias = jnp.zeros((out_features,), jnp.float32)

    features = jax.random.normal(k_f, (num_nodes, in_features), jnp.float32)

    # ----- forward -----
    # TODO(synk): basis/block weight decomposition, vertical_stacking path and
    # training-time edge dropout are not implemented (default config only).
    adj3 = build_normalized_adj(triples, num_nodes, num_relations)
    out = rgc_forward_pallas(features, weights, adj3, bias, triples=triples)
    out = jax.block_until_ready(out)

    ref_q = reference_forward_bf16(features, weights, adj3, bias)
    ref_f = reference_forward_f32(features, weights, adj3, bias)

    assert out.shape == (num_nodes, out_features)
    assert jnp.allclose(out, ref_q, atol=1e-3, rtol=1e-3), \
        "mismatch vs bf16-quantized reference"
    assert jnp.allclose(out, ref_f, atol=5e-2, rtol=5e-2), \
        "mismatch vs f32 reference"

    print("KERNEL_OK")
</pallas_src>

<mosaic_0001>
module attributes {stable_mosaic.version = 11 : i64} {
  func.func @_fw_kernel(%arg0: i32, %arg1: i32, %arg2: i32, %arg3: memref<128x128xbf16, #tpu.memory_space<vmem>>, %arg4: memref<1x128x128xbf16, #tpu.memory_space<vmem>>, %arg5: memref<1x128x128xbf16, #tpu.memory_space<vmem>>) attributes {dimension_semantics = [#tpu.dimension_semantics<parallel>, #tpu.dimension_semantics<arbitrary>, #tpu.dimension_semantics<arbitrary>], iteration_bounds = array<i64: 1, 5, 1>, scalar_prefetch = 0 : i64, scratch_operands = 0 : i64, tpu.core_type = #tpu.core_type<tc>, window_params = [{transform_indices = @transform_0, window_bounds = array<i64: 128, 128>}, {transform_indices = @transform_1, window_bounds = array<i64: 1, 128, 128>}, {transform_indices = @transform_2, window_bounds = array<i64: 1, 128, 128>}]} {
    %c0 = arith.constant 0 : index
    %c0_0 = arith.constant 0 : index
    %0 = vector.load %arg3[%c0, %c0_0] : memref<128x128xbf16, #tpu.memory_space<vmem>>, vector<128x128xbf16>
    %c0_1 = arith.constant 0 : index
    %c0_2 = arith.constant 0 : index
    %c0_3 = arith.constant 0 : index
    %1 = vector.load %arg4[%c0_1, %c0_2, %c0_3] : memref<1x128x128xbf16, #tpu.memory_space<vmem>>, vector<1x128x128xbf16>
    %2 = vector.shape_cast %1 : vector<1x128x128xbf16> to vector<128x128xbf16>
    %cst = arith.constant dense<0.000000e+00> : vector<128x128xf32>
    %3 = tpu.matmul %0, %2, %cst {dimension_numbers = #tpu.dot_dimension_numbers<[1], [0], [0], [1], [0, 0, 1, 1], [], []>} : vector<128x128xbf16>, vector<128x128xbf16>, vector<128x128xf32> -> vector<128x128xf32>
    %4 = arith.truncf %3 : vector<128x128xf32> to vector<128x128xbf16>
    %c0_4 = arith.constant 0 : index
    %c0_5 = arith.constant 0 : index
    %c0_6 = arith.constant 0 : index
    %5 = vector.load %arg5[%c0_4, %c0_5, %c0_6] : memref<1x128x128xbf16, #tpu.memory_space<vmem>>, vector<1x128x128xbf16>
    %6 = vector.shape_cast %5 : vector<1x128x128xbf16> to vector<128x128xbf16>
    %7 = vector.shape_cast %4 : vector<128x128xbf16> to vector<1x128x128xbf16>
    tpu.vector_store %arg5[%c0_4, %c0_5, %c0_6], %7 {strides = array<i32>} : memref<1x128x128xbf16, #tpu.memory_space<vmem>>, vector<1x128x128xbf16>,
    return
  }
  func.func @transform_0(%arg0: i32, %arg1: i32, %arg2: i32) -> (i32, i32) {
    %c0_i32 = arith.constant 0 : i32
    %c0_i32_0 = arith.constant 0 : i32
    return %arg0, %c0_i32 : i32, i32
  }
  func.func @transform_1(%arg0: i32, %arg1: i32, %arg2: i32) -> (i32, i32, i32) {
    %c0_i32 = arith.constant 0 : i32
    %c0_i32_0 = arith.constant 0 : i32
    return %arg1, %c0_i32, %arg2 : i32, i32, i32
  }
  func.func @transform_2(%arg0: i32, %arg1: i32, %arg2: i32) -> (i32, i32, i32) {
    %c0_i32 = arith.constant 0 : i32
    return %arg1, %arg0, %arg2 : i32, i32, i32
  }
}

</mosaic_0001>

<bundles_post_ra>
// kernel: tpu_custom_call.1
= control target key start
LH: loop header
LB: loop body
LE: loop exit
PB: predicated region body
PF: predicated region fallthrough
CT: control target
= control target key end

     0   :  { %7 = vsyncpa [#allocation3], 0  ;;  %s1316_s0 = inlined_call_operand.hbm [shape: bf16[128,128], index: 0, kind: input, shape index: {}]   ;;  %s1317_s1 = inlined_call_operand.hbm [shape: bf16[5,128,128], index: 1, kind: input, shape index: {}]   ;;  %s1318_s2 = inlined_call_operand.hbm [shape: bf16[5,128,128], index: 2, kind: output, shape index: {}]  }
   0x1   :  { %8 = vsyncpa [#allocation6], 0 }
   0x2   :  { %10 = vsyncpa [#allocation6 + $0x1], 0 }
   0x3   :  { %11 = vsyncpa [#allocation4], 0 }
   0x4   :  { %13 = vsyncpa [#allocation4 + $0x1], 0  ;;  %s1079_s9 = smov 0   ;;  %s1081_s10 = smov 0  }
   0x5   :  { %s1083_s11 = smov 0   ;;  %s1085_s12 = smov 0  }
   0x6   :  { %s1087_s13 = smov 0   ;;  %s1089_s14 = smov 0  }
   0x7 LB: > { %s640_s15 = sadd.s32 4294967295, %s1055_s14   ;;  %s641_s16 = sadd.s32 4294967294, %s1055_s14   ;;  %s1055_s14 = sphi %s1089_s14, %s19_s14   ;;  %s1051_s13 = sphi %s1087_s13, %s1341_s13   ;;  %s1047_s12 = sphi %s1085_s12, %s1340_s12   ;;  %s1043_s11 = sphi %s1083_s11, %s1339_s11   ;;  %s1039_s10 = sphi %s1081_s10, %s1338_s10   ;;  %s1035_s9 = sphi %s1079_s9, %s1337_s9  }
   0x8   : > { %p86_p0 = scmp.ne.s32.totalorder %s1039_s10, %s1035_s9  ;;  %p1113_p1 = scmp.eq.s32.totalorder %s640_s15, 0 }
   0x9   : > { %p1117_p2 = scmp.eq.s32.totalorder %s640_s15, 4  ;;  %p120_p3 = scmp.eq.s32.totalorder %s641_s16, 4 }
   0xa   : > { %s1323_s17 = scalar_select %p1113_p1, 1, 0 }
   0xb   : > { %s1324_s18 = scalar_select %p1117_p2, 1, 0 }
   0xc   : > { %p1123_p4 = por %p1113_p1, %p86_p0  ;;  %p642_p5 = scmp.ge.s32.totalorder %s1055_s14, 1 }
   0xd   : > { %p1128_p6 = por %p120_p3, %p86_p0  ;;  %p127_p7 = scmp.lt.s32.totalorder %s1055_s14, 6 }
   0xe   : > { %s1325_s19 = scalar_select %p1123_p4, 1, 0 }
   0xf   : > { %s1326_s20 = scalar_select %p1128_p6, 1, 0 }
  0x10   : > { %p1133_p8 = pnand %p642_p5, %p127_p7  ;;  %s1057_s22 = smov [#allocation2]  }
  0x11   : > { %s142_s23 = sshll.u32 %s1057_s22, 4  ;;  %s34_s25 = sadd.s32 1, %s1051_s13  ;;  %s143_s23 = int_to_ptr.vmem [resolvable:$true] %s142_s23 }
  0x12   : > { %s1327_s21 = scalar_select %p1133_p8, 1, 0 }
  0x13   : > { %p826_p9 = pneg %p1133_p8  ;;  %s911_s28 = scalar_lea.hbm %s1316_s0, 1024 }
  0x14   : > { %p912_p11 = scmp.ne.s32.totalorder %s1316_s0, %s911_s28  ;;  %p918_p3 = scmp.lt.u32.totalorder %s911_s28, %s1316_s0 }
  0x15   : > { %p1141_p10 = pnand %p826_p9, %p1113_p1 }
  0x17   : > { %p913_p12 = pneg %p1141_p10 }
  0x19   : > { %p914_p13 = pnand %p913_p12, %p912_p11 }
  0x1b   : > { %p915_p0 = pneg %p914_p13 }
  0x1d   : > { %p920_p5 = pnand %p918_p3, %p915_p0 }
  0x1f   : > { %923 = shalt.err (!%p920_p5)
}
  0x20   : > { %s924_s5 = scalar_lea.vmem %s143_s23, 1024  ;;  %p932_p4 = scmp.lt.s32.totalorder %s143_s23, %s143_s23 }
  0x21   : > { %p925_p7 = scmp.ne.s32.totalorder %s143_s23, %s924_s5  ;;  %p933_p1 = scmp.lt.s32.totalorder %s924_s5, %s924_s5 }
  0x23   : > { %p927_p9 = pnand %p925_p7, %p913_p12  ;;  %p934_p8 = por %p933_p1, %p932_p4 }
  0x25   : > { %p928_p6 = pneg %p927_p9 }
  0x27   : > { %p935_p2 = pnand %p934_p8, %p928_p6 }
  0x29   : > { %938 = shalt.err (!%p935_p2)
}
  0x2a   : > { %s1058_s6 = smov 64   ;;  %s1059_s7 = smov 4  }
  0x2b   : > { %829 = dma.hbm_to_vmem [thread:$0]  (!%p1141_p10), %s1316_s0, 1024, %s143_s23, [#allocation3], %s1058_s6, %s1058_s6, %s1059_s7  }
  0x2c   : > { %p36_p1 = scmp.ge.s32.totalorder %s34_s25, 5  ;;  %s73_s16 = sadd.s32 1, %s1043_s11 }
  0x2d   : > { %p80_p2 = scmp.ne.s32.totalorder %s1043_s11, %s1039_s10  ;;  %p81_p4 = scmp.eq.s32.totalorder %s1055_s14, 0 }
  0x2e   : > { %s1343_s25 = smov (%p36_p1, %s34_s25), 0  ;;  %p1330_p8 = scmp.ne.s32.totalorder %s1324_s18, 0 }
  0x2f   : > { %p1171_p6 = por %p81_p4, %p80_p2  ;;  %s68_s26 = ssub.s32 %s1051_s13, %s1343_s25 }
  0x30   : > { %p1177_p11 = por %p1330_p8, %p80_p2  ;;  %p839_p12 = scmp.lt.s32.totalorder %s1055_s14, 5 }
  0x31   : > { %p71_p10 = scmp.eq.s32.totalorder %s68_s26, 0  ;;  %s156_s23 = sand.u32 1, %s1043_s11  }
  0x32   : > { %s645_s27 = sshll.u32 %s156_s23, 6  ;;  %s689_s29 = sshll.u32 %s1051_s13, 10 }
  0x33   : > { %s1186_s28 = scalar_select %p71_p10, %s1043_s11, %s73_s16  }
  0x34   : > { %s1192_s4 = scalar_lea.hbm %s1317_s1, %s689_s29  ;;  %s160_s18 = scalar_lea.vmem [#allocation5], %s645_s27 }
  0x35   : > { %s168_s5 = sshll.u32 %s160_s18, 4  ;;  %p1198_p13 = pnand %p839_p12, %p1171_p6  ;;  %s1194_s5 = int_to_ptr.vmem [resolvable:$true] %s168_s5 }
  0x36   : > { %s1202_s15 = scalar_lea.sflag [#allocation6], %s156_s23  ;;  %s939_s16 = scalar_lea.hbm %s1192_s4, 1024 }
  0x37   : > { %p940_p0 = scmp.ne.s32.totalorder %s1192_s4, %s939_s16  ;;  %p941_p3 = pneg %p1198_p13 }
  0x38   : > { %s944_s22 = scalar_lea.hbm %s1317_s1, 5120  ;;  %p945_p9 = scmp.lt.u32.totalorder %s1192_s4, %s1317_s1 }
  0x39   : > { %p942_p5 = pnand %p941_p3, %p940_p0  ;;  %p946_p1 = scmp.lt.u32.totalorder %s944_s22, %s939_s16 }
  0x3a   : > { %p948_p4 = scmp.lt.u32.totalorder %s939_s16, %s1192_s4 }
  0x3b   : > { %p943_p7 = pneg %p942_p5  ;;  %p947_p2 = por %p946_p1, %p945_p9 }
  0x3d   : > { %p949_p6 = por %p948_p4, %p947_p2 }
  0x3f   : > { %p950_p8 = pnand %p949_p6, %p943_p7 }
  0x41   : > { %953 = shalt.err (!%p950_p8)
}
  0x42   : > { %s954_s23 = scalar_lea.vmem %s1194_s5, 1024  ;;  %s1060_s3 = smov [#allocation5]  }
  0x43   : > { %p955_p12 = scmp.ne.s32.totalorder %s1194_s5, %s954_s23  ;;  %s959_s18 = sshll.u32 %s1060_s3, 4  ;;  %s960_s18 = int_to_ptr.vmem [resolvable:$false] %s959_s18 }
  0x44   : > { %s961_s26 = scalar_lea.vmem %s960_s18, 2048  ;;  %p962_p5 = scmp.lt.s32.totalorder %s1194_s5, %s960_s18 }
  0x45   : > { %p957_p10 = pnand %p955_p12, %p941_p3  ;;  %p963_p9 = scmp.lt.s32.totalorder %s961_s26, %s954_s23 }
  0x47   : > { %p958_p0 = pneg %p957_p10  ;;  %p964_p1 = por %p963_p9, %p962_p5 }
  0x49   : > { %p965_p2 = pnand %p964_p1, %p958_p0 }
  0x4b   : > { %968 = shalt.err (!%p965_p2)
}
  0x4c   : > { %833 = dma.hbm_to_vmem [thread:$0]  (!%p1198_p13), %s1192_s4, 1024, %s1194_s5, %s1202_s15, %s1058_s6, %s1058_s6, %s1059_s7  }
  0x4d   : > { %p1333_p3 = scmp.ne.s32.totalorder %s1327_s21, 0 }
  0x4e   : > { %p1334_p7 = scmp.ne.s32.totalorder (!%p1333_p3), %s1323_s17, 0 }
  0x4f   : > { %180 = sbr.rel (%p1333_p3) target bundleno = 364 (0x16c), region = 28 }
  0x56   : > { %1022 = dma.done.wait (%p1334_p7), [#allocation3], 1024  }
  0x57   : > { %1024 = vsyncadd (%p1334_p7), [#allocation3], 4294966272  ;;  %s1240_s16 = sand.u32 1, %s1039_s10   ;;  %p1335_p13 = scmp.ne.s32.totalorder %s1325_s19, 0 }
  0x58   : > { %s650_s8 = sshll.u32 %s1240_s16, 6  ;;  %s187_s27 = scalar_lea.sflag [#allocation6], %s1240_s16 }
  0x59   : > { %s1246_s6 = scalar_lea.vmem [#allocation5], %s650_s8 }
  0x5a   : > { %1026 = dma.done.wait (%p1335_p13), %s187_s27, 1024  }
  0x5b   : > { %1028 = vsyncadd (%p1335_p13), %s187_s27, 4294966272  ;;  %v895_v0 = vld [vmem:[%s1246_s6] sm:$0xff]   ;;  %v896_v1 = vld [vmem:[%s1246_s6 + $0x8] sm:$0xff]   ;;  %s210_s17 = scalar_lea.vmem [#allocation7], %s650_s8  ;;  %s706_s21 = sshll.u32 %s1047_s12, 10 }
  0x5c   : > { %770 = vmatprep.subr.bf16.mxu0 %v895_v0  ;;  %802 = vmatprep.subr.bf16.mxu1 %v895_v0  ;;  %v897_v2 = vld [vmem:[%s1246_s6 + $0x10] sm:$0xff]   ;;  %v898_v3 = vld [vmem:[%s1246_s6 + $0x18] sm:$0xff]   ;;  %v903_v4 = vld [vmem:[#allocation2] sm:$0xff]   ;;  %s536_s19 = sshll.u32 %s210_s17, 4  ;;  %s1268_s5 = scalar_lea.hbm %s1318_s2, %s706_s21  ;;  %s1263_s19 = int_to_ptr.vmem [resolvable:$true] %s536_s19 }
  0x5d   : > { %771 = vmatpush3.bf16.msra.mxu0 %v895_v0  ;;  %810 = vmatpush3.bf16.msra.mxu1 %v895_v0  ;;  %v904_v5 = vld [vmem:[#allocation2 + $0x20] sm:$0xff]   ;;  %v900_v7 = vld [vmem:[%s1246_s6 + $0x28] sm:$0xff]   ;;  %v901_v8 = vld [vmem:[%s1246_s6 + $0x30] sm:$0xff]   ;;  %s520_s12 = scalar_lea.sflag [#allocation4], %s1240_s16  ;;  %s969_s15 = scalar_lea.vmem %s1263_s19, 1024 }
  0x5e   : > { %772 = vmatprep.subr.bf16.mxu0 %v896_v1  ;;  %803 = vmatprep.subr.bf16.mxu1 %v896_v1  ;;  %v899_v6 = vld [vmem:[%s1246_s6 + $0x20] sm:$0xff]   ;;  %v902_v9 = vld [vmem:[%s1246_s6 + $0x38] sm:$0xff]   ;;  %v905_v10 = vld [vmem:[#allocation2 + $0x8] sm:$0xff]   ;;  %p970_p4 = scmp.ne.s32.totalorder %s1263_s19, %s969_s15  ;;  %s1061_s22 = smov [#allocation7]  }
  0x5f   : > { %786 = vmatprep.mubr.bf16.mxu0 %v903_v4  ;;  %794 = vmatprep.mubr.bf16.mxu1 %v904_v5  ;;  %v906_v11 = vld [vmem:[#allocation2 + $0x28] sm:$0xff]   ;;  %v907_v12 = vld [vmem:[#allocation2 + $0x10] sm:$0xff]   ;;  %v909_v14 = vld [vmem:[#allocation2 + $0x18] sm:$0xff]   ;;  %s973_s29 = sshll.u32 %s1061_s22, 4  ;;  %s974_s29 = int_to_ptr.vmem [resolvable:$false] %s973_s29 }
  0x60   : > { %v908_v13 = vld [vmem:[#allocation2 + $0x30] sm:$0xff]   ;;  %v910_v15 = vld [vmem:[#allocation2 + $0x38] sm:$0xff]   ;;  %p971_p6 = pnand %p970_p4, %p1177_p11  ;;  %s975_s30 = scalar_lea.vmem %s974_s29, 2048 }
  0x61   : > { %773 = vmatpush3.bf16.msra.mxu0 %v896_v1  ;;  %811 = vmatpush3.bf16.msra.mxu1 %v896_v1  ;;  %p976_p12 = scmp.lt.s32.totalorder %s1263_s19, %s974_s29  ;;  %p977_p10 = scmp.lt.s32.totalorder %s975_s30, %s969_s15 }
  0x62   : > { %774 = vmatprep.subr.bf16.mxu0 %v897_v2  ;;  %804 = vmatprep.subr.bf16.mxu1 %v897_v2  ;;  %p972_p8 = pneg %p971_p6 }
  0x63   : > { %p978_p0 = por %p977_p10, %p976_p12 }
  0x65   : > { %775 = vmatpush3.bf16.msra.mxu0 %v897_v2  ;;  %812 = vmatpush3.bf16.msra.mxu1 %v897_v2  ;;  %p979_p5 = pnand %p978_p0, %p972_p8 }
  0x66   : > { %776 = vmatprep.subr.bf16.mxu0 %v898_v3  ;;  %805 = vmatprep.subr.bf16.mxu1 %v898_v3 }
  0x69   : > { %777 = vmatpush3.bf16.msra.mxu0 %v898_v3  ;;  %813 = vmatpush3.bf16.msra.mxu1 %v898_v3 }
  0x6a   : > { %778 = vmatprep.subr.bf16.mxu0 %v899_v6  ;;  %806 = vmatprep.subr.bf16.mxu1 %v899_v6 }
  0x6d   : > { %779 = vmatpush3.bf16.msra.mxu0 %v899_v6  ;;  %814 = vmatpush3.bf16.msra.mxu1 %v899_v6 }
  0x6e   : > { %780 = vmatprep.subr.bf16.mxu0 %v900_v7  ;;  %807 = vmatprep.subr.bf16.mxu1 %v900_v7 }
  0x71   : > { %781 = vmatpush3.bf16.msra.mxu0 %v900_v7  ;;  %815 = vmatpush3.bf16.msra.mxu1 %v900_v7 }
  0x72   : > { %782 = vmatprep.subr.bf16.mxu0 %v901_v8  ;;  %808 = vmatprep.subr.bf16.mxu1 %v901_v8 }
  0x75   : > { %783 = vmatpush3.bf16.msra.mxu0 %v901_v8  ;;  %816 = vmatpush3.bf16.msra.mxu1 %v901_v8 }
  0x76   : > { %784 = vmatprep.subr.bf16.mxu0 %v902_v9  ;;  %809 = vmatprep.subr.bf16.mxu1 %v902_v9 }
  0x79   : > { %785 = vmatpush3.bf16.msra.mxu0 %v902_v9  ;;  %817 = vmatpush3.bf16.msra.mxu1 %v902_v9 }
  0x7c   : > { %787 = vmatmul.mubr.bf16.vlgmr.msra.gmra.mrb[0].mxu0 %v905_v10  ;;  %795 = vmatmul.mubr.bf16.vlgmr.msra.gmra.mrb[0].mxu1 %v906_v11 }
  0x7d   : > { %790 = vmatprep.mubr.bf16.mxu0 %v907_v12  ;;  %798 = vmatprep.mubr.bf16.mxu1 %v908_v13 }
  0x84   : > { %791 = vmatmul.mubr.bf16.gmra.mrb[4].mxu0 %v909_v14  ;;  %799 = vmatmul.mubr.bf16.gmra.mrb[4].mxu1 %v910_v15 }
 0x14f   : > { %v788_v16 = vpop.f32.mrb[0].mxu0  ;;  %v796_v17 = vpop.f32.mrb[0].mxu1 }
 0x150   : > { %v376_v18 = vpop.f32.mrb[1].mxu0  ;;  %v408_v19 = vpop.f32.mrb[1].mxu1 }
 0x151   : > { %v789_v20 = vpop.f32.mrb[2].mxu0  ;;  %v797_v21 = vpop.f32.mrb[2].mxu1 }
 0x152   : > { %v715_v22 = vpack.c.bf16 %v789_v20, %v788_v16  ;;  %v735_v23 = vpack.c.bf16 %v797_v21, %v796_v17  ;;  %v379_v24 = vpop.f32.mrb[3].mxu0  ;;  %v411_v25 = vpop.f32.mrb[3].mxu1 }
 0x153   : > { %v710_v26 = vpack.c.bf16 %v379_v24, %v376_v18  ;;  %v730_v27 = vpack.c.bf16 %v411_v25, %v408_v19 }
 0x154   : > { %747 = vst [vmem:[%s210_s17 + $0x8] sm:$0xff] %v715_v22   ;;  %751 = vst [vmem:[%s210_s17 + $0x28] sm:$0xff] %v735_v23  }
 0x155   : > { %711 = vst [vmem:[%s210_s17] sm:$0xff] %v710_v26   ;;  %750 = vst [vmem:[%s210_s17 + $0x20] sm:$0xff] %v730_v27  }
 0x157   : > { %v792_v28 = vpop.f32.mrb[4].mxu0  ;;  %v800_v29 = vpop.f32.mrb[4].mxu1 }
 0x158   : > { %v392_v30 = vpop.f32.mrb[5].mxu0  ;;  %v424_v31 = vpop.f32.mrb[5].mxu1 }
 0x159   : > { %v793_v32 = vpop.f32.mrb[6].mxu0  ;;  %v801_v33 = vpop.f32.mrb[6].mxu1 }
 0x15a   : > { %v725_v34 = vpack.c.bf16 %v793_v32, %v792_v28  ;;  %v745_v35 = vpack.c.bf16 %v801_v33, %v800_v29  ;;  %v395_v36 = vpop.f32.mrb[7].mxu0  ;;  %v427_v37 = vpop.f32.mrb[7].mxu1 }
 0x15b   : > { %v720_v38 = vpack.c.bf16 %v395_v36, %v392_v30  ;;  %v740_v39 = vpack.c.bf16 %v427_v37, %v424_v31 }
 0x15c   : > { %749 = vst [vmem:[%s210_s17 + $0x18] sm:$0xff] %v725_v34   ;;  %753 = vst [vmem:[%s210_s17 + $0x38] sm:$0xff] %v745_v35  }
 0x15d   : > { %748 = vst [vmem:[%s210_s17 + $0x10] sm:$0xff] %v720_v38   ;;  %752 = vst [vmem:[%s210_s17 + $0x30] sm:$0xff] %v740_v39  }
 0x15e   : > { %982 = shalt.err (!%p979_p5)
}
 0x15f   : > { %s983_s23 = scalar_lea.hbm %s1268_s5, 1024  ;;  %s987_s26 = scalar_lea.hbm %s1318_s2, 5120 }
 0x160   : > { %p984_p9 = scmp.ne.s32.totalorder %s1268_s5, %s983_s23  ;;  %p988_p3 = scmp.lt.u32.totalorder %s1268_s5, %s1318_s2 }
 0x161   : > { %p989_p7 = scmp.lt.u32.totalorder %s987_s26, %s983_s23  ;;  %p991_p4 = scmp.lt.u32.totalorder %s983_s23, %s1268_s5 }
 0x162   : > { %p985_p1 = pnand %p984_p9, %p1177_p11 }
 0x163   : > { %p990_p13 = por %p989_p7, %p988_p3 }
 0x164   : > { %p986_p2 = pneg %p985_p1 }
 0x165   : > { %p992_p6 = por %p991_p4, %p990_p13 }
 0x167   : > { %p993_p8 = pnand %p992_p6, %p986_p2 }
 0x169   : > { %996 = shalt.err (!%p993_p8)
}
 0x16a   : > { %s1062_s6 = smov 64   ;;  %s1063_s17 = smov 4  }
 0x16b   : > { %824 = dma.vmem_to_hbm [thread:$0]  (%p1177_p11), %s1263_s19, 1024, %s1268_s5, %s520_s12, %s1062_s6, %s1062_s6, %s1063_s17  }
 0x16c PF: > { %p841_p12 = scmp.ge.s32.totalorder %s1055_s14, 2  ;;  %s551_s21 = sand.u32 1, %s1035_s9  }
 0x16d   : > { %p1336_p10 = scmp.ne.s32.totalorder %s1326_s20, 0  ;;  %s552_s7 = scalar_lea.sflag [#allocation4], %s551_s21 }
 0x16f   : > { %p835_p0 = pnand %p841_p12, %p1336_p10 }
 0x171   : > { %1030 = dma.done.wait (!%p835_p0), %s552_s7, 1024  }
 0x172   : > { %1032 = vsyncadd (!%p835_p0), %s552_s7, 4294966272  ;;  %s19_s14 = sadd.s32 1, %s1055_s14   ;;  %s1337_s9 = smov %s1039_s10 }
 0x173   : > { %p16_p5 = scmp.ge.s32.totalorder %s19_s14, 7   ;;  %s1338_s10 = smov %s1043_s11 }
 0x174   : > { %s1339_s11 = smov %s1186_s28  ;;  %s1340_s12 = smov %s1051_s13 }
 0x175   : > { %s1341_s13 = smov %s1343_s25  ;;  %18 = sbr.rel (!%p16_p5) target bundleno = 7 (0x7), region = 79 }
 0x17c   :  { %557 = vsyncpa [#allocation3], 1 }
 0x17d   :  { %559 = vsyncpa [#allocation3 + $0x1], 1 }
 0x17e   :  { %560 = vsyncpa [#allocation6], 1 }
 0x17f   :  { %562 = vsyncpa [#allocation6 + $0x1], 1 }
 0x180   :  { %563 = vsyncpa [#allocation4], 1 }
 0x181   :  { %565 = vsyncpa [#allocation4 + $0x1], 1 }

</bundles_post_ra>
